<compile_context>
chip_gen: v7x
topology: tpu7x:2x2x1
jax: 0.10.0
libtpu: 0.0.40
codegen_flags: <defaults>
</compile_context>

<pallas_src>
import functools

import jax
import jax.numpy as jnp
from jax.experimental import pallas as pl
from jax.experimental.pallas import tpu as pltpu

_EPS = 1e-6  # F.pairwise_distance default eps (added to the difference, per PyTorch docs)


def _triplet_loss_kernel(a_ref, p_ref, n_ref, o_ref, *, margin, batch, block_rows):
    a = a_ref[...].astype(jnp.float32)
    p = p_ref[...].astype(jnp.float32)
    n = n_ref[...].astype(jnp.float32)

    # pairwise_distance: ||a - b + eps||_2 along the feature axis
    dp = a - p + _EPS
    dn = a - n + _EPS
    pos_dist = jnp.sqrt(jnp.sum(dp * dp, axis=-1, keepdims=True))  # (TB, 1)
    neg_dist = jnp.sqrt(jnp.sum(dn * dn, axis=-1, keepdims=True))  # (TB, 1)

    hinge = jnp.maximum(pos_dist - neg_dist + margin, 0.0)          # (TB, 1)

    # Per-block partial sum, broadcast into the lane-dense (1, 8, 128) output tile.
    o_ref[...] = jnp.broadcast_to(jnp.sum(hinge), o_ref.shape)

    # Partial last tile: re-store the masked sum, only when it can matter.
    rem = batch % block_rows
    if rem != 0:
        @pl.when(pl.program_id(0) == pl.num_programs(0) - 1)
        def _():
            row = jax.lax.broadcasted_iota(jnp.int32, (block_rows, 1), 0)
            masked = jnp.where(row < rem, hinge, 0.0)   # select kills NaN from padded rows
            o_ref[...] = jnp.broadcast_to(jnp.sum(masked), o_ref.shape)


def _choose_block_rows(B, D, itemsize):
    """Byte-based batch tile: multiple of 8, sized for ~12 MiB/step and <=2 MiB/buffer."""
    # Per grid step VMEM footprint:
    #   3 inputs x 2 pipeline buffers           -> 6 * tb * D * itemsize (actual input dtype)
    #   ~5 tile-sized f32 temporaries (upcasts, dp, dn) -> 5 * tb * D * 4
    # 12 MiB total fits v5e's 16 MiB default scoped VMEM with headroom (and trivially
    # v6e's 32 MiB default / v7x's 64 MiB physical).
    budget = 12 * 1024 * 1024
    per_row = D * (6 * itemsize + 5 * 4)
    tb = budget // per_row
    # Keep each individual pipeline buffer in the ~1-2 MiB DMA-efficiency sweet spot.
    tb = min(tb, (2 * 1024 * 1024) // (D * itemsize))
    tb = max(8, (tb // 8) * 8)
    if tb >= B:
        return B                                # single block covering the whole batch
    return tb


def triplet_loss(anchor, positive, negative, margin=1.0, block_rows=None):
    """Pallas TPU implementation of TripletLoss.forward. Returns a scalar f32."""
    assert anchor.shape == positive.shape == negative.shape
    assert anchor.ndim == 2, "expected (B, D) embeddings"
    B, D = anchor.shape
    itemsize = jnp.dtype(anchor.dtype).itemsize

    tb = _choose_block_rows(B, D, itemsize) if block_rows is None else int(block_rows)
    nb = pl.cdiv(B, tb)

    kernel = functools.partial(
        _triplet_loss_kernel, margin=float(margin), batch=B, block_rows=tb
    )

    cost = pl.CostEstimate(
        flops=8 * B * D,                     # diffs, squares, reduces, hinge
        transcendentals=2 * B,               # two sqrt per row
        bytes_accessed=3 * B * D * itemsize + nb * 8 * 128 * 4,
    )

    partials = pl.pallas_call(
        kernel,
        out_shape=jax.ShapeDtypeStruct((nb, 8, 128), jnp.float32),
        grid_spec=pltpu.PrefetchScalarGridSpec(
            num_scalar_prefetch=0,
            grid=(nb,),
            # Full D per block (legal: equals the full array dim); TB is a multiple of 8
            # (or equals B), so the (8, 128) rule is satisfied either way.
            in_specs=[
                pl.BlockSpec((tb, D), lambda i: (i, 0)),
                pl.BlockSpec((tb, D), lambda i: (i, 0)),
                pl.BlockSpec((tb, D), lambda i: (i, 0)),
            ],
            # One independent, lane-dense (8, 128) partial-sum tile per grid step.
            out_specs=pl.BlockSpec((1, 8, 128), lambda i: (i, 0, 0)),
        ),
        compiler_params=pltpu.CompilerParams(
            # No carried state -> the batch axis can be sharded across TensorCores (v7x).
            dimension_semantics=("parallel",),
        ),
        cost_estimate=cost,
    )(anchor, positive, negative)

    # Tiny final reduction over per-block partials in plain JAX.
    return jnp.sum(partials[:, 0, 0]) / B


def _reference_triplet_loss(anchor, positive, negative, margin=1.0):
    """Pure-JAX reference mirroring the PyTorch module."""
    a = anchor.astype(jnp.float32)
    p = positive.astype(jnp.float32)
    n = negative.astype(jnp.float32)
    pos = jnp.sqrt(jnp.sum((a - p + _EPS) ** 2, axis=-1))
    neg = jnp.sqrt(jnp.sum((a - n + _EPS) ** 2, axis=-1))
    return jnp.mean(jnp.maximum(pos - neg + margin, 0.0))


if __name__ == "__main__":
    key = jax.random.PRNGKey(0)

    # Test 1: small embedding batch, single-tile path.
    B, D = 8, 32
    k_a, k_p, k_n, key = jax.random.split(key, 4)
    anchor = jax.random.normal(k_a, (B, D), dtype=jnp.float32)
    positive = jax.random.normal(k_p, (B, D), dtype=jnp.float32)
    negative = jax.random.normal(k_n, (B, D), dtype=jnp.float32)

    loss = triplet_loss(anchor, positive, negative, margin=1.0)
    jax.block_until_ready(loss)
    ref = _reference_triplet_loss(anchor, positive, negative, margin=1.0)
    assert jnp.allclose(loss, ref, atol=1e-5, rtol=1e-5), (loss, ref)

    # Test 2: multi-tile path with a partial (masked) last tile and a forced small tile.
    B2 = 40
    k_a, k_p, k_n, key = jax.random.split(key, 4)
    anchor2 = jax.random.normal(k_a, (B2, D), dtype=jnp.float32)
    positive2 = jax.random.normal(k_p, (B2, D), dtype=jnp.float32)
    negative2 = jax.random.normal(k_n, (B2, D), dtype=jnp.float32)

    loss2 = triplet_loss(anchor2, positive2, negative2, margin=1.0, block_rows=16)
    jax.block_until_ready(loss2)
    ref2 = _reference_triplet_loss(anchor2, positive2, negative2, margin=1.0)
    assert jnp.allclose(loss2, ref2, atol=1e-5, rtol=1e-5), (loss2, ref2)

    # Test 3: bf16 inputs (in-kernel f32 upcast), multi-tile, evenly divided batch.
    B3, D3 = 24, 128
    k_a, k_p, k_n, key = jax.random.split(key, 4)
    anchor3 = jax.random.normal(k_a, (B3, D3), dtype=jnp.bfloat16)
    positive3 = jax.random.normal(k_p, (B3, D3), dtype=jnp.bfloat16)
    negative3 = jax.random.normal(k_n, (B3, D3), dtype=jnp.bfloat16)

    loss3 = triplet_loss(anchor3, positive3, negative3, margin=1.0, block_rows=8)
    jax.block_until_ready(loss3)
    ref3 = _reference_triplet_loss(anchor3, positive3, negative3, margin=1.0)
    assert jnp.allclose(loss3, ref3, atol=1e-4, rtol=1e-4), (loss3, ref3)

    print("KERNEL_OK")
</pallas_src>

<mosaic_0001>
module attributes {stable_mosaic.version = 11 : i64} {
  func.func @_triplet_loss_kernel(%arg0: i32, %arg1: memref<8x32xf32, #tpu.memory_space<vmem>>, %arg2: memref<8x32xf32, #tpu.memory_space<vmem>>, %arg3: memref<8x32xf32, #tpu.memory_space<vmem>>, %arg4: memref<1x8x128xf32, #tpu.memory_space<vmem>>) attributes {dimension_semantics = [#tpu.dimension_semantics<parallel>], iteration_bounds = array<i64: 1>, scalar_prefetch = 0 : i64, scratch_operands = 0 : i64, tpu.core_type = #tpu.core_type<tc>, window_params = [{transform_indices = @transform_0, window_bounds = array<i64: 8, 32>}, {transform_indices = @transform_1, window_bounds = array<i64: 8, 32>}, {transform_indices = @transform_2, window_bounds = array<i64: 8, 32>}, {transform_indices = @transform_3, window_bounds = array<i64: 1, 8, 128>}]} {
    %c0 = arith.constant 0 : index
    %c0_0 = arith.constant 0 : index
    %0 = vector.load %arg1[%c0, %c0_0] : memref<8x32xf32, #tpu.memory_space<vmem>>, vector<8x32xf32>
    %c0_1 = arith.constant 0 : index
    %c0_2 = arith.constant 0 : index
    %1 = vector.load %arg2[%c0_1, %c0_2] : memref<8x32xf32, #tpu.memory_space<vmem>>, vector<8x32xf32>
    %c0_3 = arith.constant 0 : index
    %c0_4 = arith.constant 0 : index
    %2 = vector.load %arg3[%c0_3, %c0_4] : memref<8x32xf32, #tpu.memory_space<vmem>>, vector<8x32xf32>
    %3 = arith.subf %0, %1 : vector<8x32xf32>
    %cst = arith.constant 9.99999997E-7 : f32
    %4 = vector.broadcast %cst : f32 to vector<8x32xf32>
    %5 = arith.addf %3, %4 : vector<8x32xf32>
    %6 = arith.subf %0, %2 : vector<8x32xf32>
    %cst_5 = arith.constant 9.99999997E-7 : f32
    %7 = vector.broadcast %cst_5 : f32 to vector<8x32xf32>
    %8 = arith.addf %6, %7 : vector<8x32xf32>
    %9 = arith.mulf %5, %5 : vector<8x32xf32>
    %cst_6 = arith.constant dense<0.000000e+00> : vector<8xf32>
    %10 = vector.multi_reduction <add>, %9, %cst_6 [1] : vector<8x32xf32> to vector<8xf32>
    %11 = vector.shape_cast %10 : vector<8xf32> to vector<8x1xf32>
    %12 = math.sqrt %11 : vector<8x1xf32>
    %13 = arith.mulf %8, %8 : vector<8x32xf32>
    %cst_7 = arith.constant dense<0.000000e+00> : vector<8xf32>
    %14 = vector.multi_reduction <add>, %13, %cst_7 [1] : vector<8x32xf32> to vector<8xf32>
    %15 = vector.shape_cast %14 : vector<8xf32> to vector<8x1xf32>
    %16 = math.sqrt %15 : vector<8x1xf32>
    %17 = arith.subf %12, %16 : vector<8x1xf32>
    %cst_8 = arith.constant 1.000000e+00 : f32
    %18 = vector.broadcast %cst_8 : f32 to vector<8x1xf32>
    %19 = arith.addf %17, %18 : vector<8x1xf32>
    %cst_9 = arith.constant 0.000000e+00 : f32
    %20 = vector.broadcast %cst_9 : f32 to vector<8x1xf32>
    %21 = arith.maximumf %19, %20 : vector<8x1xf32>
    %22 = vector.shape_cast %21 : vector<8x1xf32> to vector<1x8x1xf32>
    %cst_10 = arith.constant dense<0.000000e+00> : vector<1xf32>
    %23 = vector.multi_reduction <add>, %22, %cst_10 [1, 2] : vector<1x8x1xf32> to vector<1xf32>
    %24 = vector.shape_cast %23 : vector<1xf32> to vector<1x1x1xf32>
    %25 = vector.extract %24[0, 0, 0] : f32 from vector<1x1x1xf32>
    %26 = vector.broadcast %25 : f32 to vector<1x8x128xf32>
    %c0_11 = arith.constant 0 : index
    %c0_12 = arith.constant 0 : index
    %c0_13 = arith.constant 0 : index
    %27 = vector.load %arg4[%c0_11, %c0_12, %c0_13] : memref<1x8x128xf32, #tpu.memory_space<vmem>>, vector<1x8x128xf32>
    tpu.vector_store %arg4[%c0_11, %c0_12, %c0_13], %26 {strides = array<i32>} : memref<1x8x128xf32, #tpu.memory_space<vmem>>, vector<1x8x128xf32>,
    return
  }
  func.func @transform_0(%arg0: i32) -> (i32, i32) {
    %c0_i32 = arith.constant 0 : i32
    %c0_i32_0 = arith.constant 0 : i32
    return %arg0, %c0_i32 : i32, i32
  }
  func.func @transform_1(%arg0: i32) -> (i32, i32) {
    %c0_i32 = arith.constant 0 : i32
    %c0_i32_0 = arith.constant 0 : i32
    return %arg0, %c0_i32 : i32, i32
  }
  func.func @transform_2(%arg0: i32) -> (i32, i32) {
    %c0_i32 = arith.constant 0 : i32
    %c0_i32_0 = arith.constant 0 : i32
    return %arg0, %c0_i32 : i32, i32
  }
  func.func @transform_3(%arg0: i32) -> (i32, i32, i32) {
    %c0_i32 = arith.constant 0 : i32
    %c0_i32_0 = arith.constant 0 : i32
    %c0_i32_1 = arith.constant 0 : i32
    return %arg0, %c0_i32, %c0_i32_0 : i32, i32, i32
  }
}

</mosaic_0001>

<bundles_post_ra>
// kernel: tpu_custom_call.1
= control target key start
LH: loop header
LB: loop body
LE: loop exit
PB: predicated region body
PF: predicated region fallthrough
CT: control target
= control target key end

     0   :  { %8 = vsyncpa [#allocation3], 0  ;;  %s288_s0 = inlined_call_operand.hbm [shape: f32[8,32], index: 0, kind: input, shape index: {}]   ;;  %s289_s1 = inlined_call_operand.hbm [shape: f32[8,32], index: 1, kind: input, shape index: {}]   ;;  %s290_s2 = inlined_call_operand.hbm [shape: f32[8,32], index: 2, kind: input, shape index: {}]   ;;  %s291_s3 = inlined_call_operand.hbm [shape: f32[1,8,128], index: 3, kind: output, shape index: {}]  }
   0x1   :  { %9 = vsyncpa [#allocation6], 0 }
   0x2   :  { %10 = vsyncpa [#allocation4], 0  ;;  %s216_s12 = smov [#allocation5]   ;;  %s217_s14 = smov [#allocation2]  }
   0x3   :  { %s27_s13 = sshll.u32 %s216_s12, 4  ;;  %s17_s15 = sshll.u32 %s217_s14, 4  ;;  %s28_s13 = int_to_ptr.vmem [resolvable:$true] %s27_s13  ;;  %s18_s15 = int_to_ptr.vmem [resolvable:$true] %s17_s15 }
   0x4   :  { %s122_s18 = scalar_lea.hbm %s289_s1, 128 }
   0x5   :  { %p123_p0 = scmp.ne.s32.totalorder %s289_s1, %s122_s18  ;;  %p126_p1 = scmp.lt.u32.totalorder %s122_s18, %s289_s1 }
   0x7   :  { %p128_p2 = pnand %p126_p1, %p123_p0 }
   0x9   :  { %131 = shalt.err (!%p128_p2)
}
   0xa   :  { %s132_s23 = scalar_lea.vmem %s28_s13, 128  ;;  %p137_p4 = scmp.lt.s32.totalorder %s28_s13, %s28_s13 }
   0xb   :  { %p133_p3 = scmp.ne.s32.totalorder %s28_s13, %s132_s23  ;;  %p138_p5 = scmp.lt.s32.totalorder %s132_s23, %s132_s23 }
   0xd   :  { %p139_p6 = por %p138_p5, %p137_p4 }
   0xf   :  { %p140_p7 = pnand %p139_p6, %p133_p3 }
  0x11   :  { %143 = shalt.err (!%p140_p7)
}
  0x12   :  { %30 = dma.hbm_to_vmem [thread:$0]  %s289_s1, 128, %s28_s13, [#allocation6]  }
  0x13   :  { %s144_s28 = scalar_lea.hbm %s288_s0, 128 }
  0x14   :  { %p145_p8 = scmp.ne.s32.totalorder %s288_s0, %s144_s28  ;;  %p148_p9 = scmp.lt.u32.totalorder %s144_s28, %s288_s0 }
  0x16   :  { %p150_p10 = pnand %p148_p9, %p145_p8 }
  0x18   :  { %153 = shalt.err (!%p150_p10)
}
  0x19   :  { %s154_s6 = scalar_lea.vmem %s18_s15, 128  ;;  %p159_p12 = scmp.lt.s32.totalorder %s18_s15, %s18_s15 }
  0x1a   :  { %p155_p11 = scmp.ne.s32.totalorder %s18_s15, %s154_s6  ;;  %p160_p13 = scmp.lt.s32.totalorder %s154_s6, %s154_s6 }
  0x1c   :  { %p161_p0 = por %p160_p13, %p159_p12 }
  0x1e   :  { %p162_p1 = pnand %p161_p0, %p155_p11 }
  0x20   :  { %165 = shalt.err (!%p162_p1)
}
  0x21   :  { %20 = dma.hbm_to_vmem [thread:$0]  %s288_s0, 128, %s18_s15, [#allocation3]  }
  0x22   :  { %s218_s8 = smov [#allocation7]   ;;  %s166_s12 = scalar_lea.hbm %s290_s2, 128 }
  0x23   :  { %s37_s9 = sshll.u32 %s218_s8, 4  ;;  %p167_p2 = scmp.ne.s32.totalorder %s290_s2, %s166_s12  ;;  %s38_s9 = int_to_ptr.vmem [resolvable:$true] %s37_s9 }
  0x24   :  { %p170_p3 = scmp.lt.u32.totalorder %s166_s12, %s290_s2 }
  0x26   :  { %p172_p4 = pnand %p170_p3, %p167_p2 }
  0x28   :  { %175 = shalt.err (!%p172_p4)
}
  0x29   :  { %s176_s18 = scalar_lea.vmem %s38_s9, 128  ;;  %p181_p6 = scmp.lt.s32.totalorder %s38_s9, %s38_s9 }
  0x2a   :  { %p177_p5 = scmp.ne.s32.totalorder %s38_s9, %s176_s18  ;;  %p182_p7 = scmp.lt.s32.totalorder %s176_s18, %s176_s18 }
  0x2c   :  { %p183_p8 = por %p182_p7, %p181_p6 }
  0x2e   :  { %p184_p9 = pnand %p183_p8, %p177_p5 }
  0x30   :  { %187 = shalt.err (!%p184_p9)
}
  0x31   :  { %40 = dma.hbm_to_vmem [thread:$0]  %s290_s2, 128, %s38_s9, [#allocation6]  }
  0x32   :  { %210 = dma.done.wait [#allocation3], 128  }
  0x33   :  { %211 = vsyncadd [#allocation3], 4294967168 }
  0x34   :  { %212 = dma.done.wait [#allocation6], 256  }
  0x35   :  { %213 = vsyncadd [#allocation6], 4294967040  ;;  %v50_v0 = vld [vmem:[#allocation2] sm:$0xff]  ;;  %v51_v1 = vld [vmem:[#allocation5] sm:$0xff]  ;;  %vm58_vm0 = vcmask 261120   ;;  %vm83_vm5 = vcmask 7168  }
  0x36   :  { %v52_v2 = vld [vmem:[#allocation7] sm:$0xff]  ;;  %v53_v3 = vsub.f32 %v50_v0, %v51_v1  ;;  %s219_s2 = smov [#allocation8]  }
  0x37   :  { %v55_v4 = vsub.f32 %v50_v0, %v52_v2  ;;  %s102_s19 = sshll.u32 %s219_s2, 4  ;;  %s103_s19 = int_to_ptr.vmem [resolvable:$true] %s102_s19 }
  0x38   :  { %v54_v5 = vadd.f32 1e-06, %v53_v3  ;;  %s188_s21 = scalar_lea.vmem %s103_s19, 128  ;;  %p193_p11 = scmp.lt.s32.totalorder %s103_s19, %s103_s19 }
  0x39   :  { %v56_v6 = vadd.f32 1e-06, %v55_v4  ;;  %p189_p10 = scmp.ne.s32.totalorder %s103_s19, %s188_s21  ;;  %p194_p12 = scmp.lt.s32.totalorder %s188_s21, %s188_s21 }
  0x3a   :  { %v57_v7 = vmul.f32 %v54_v5, %v54_v5 }
  0x3b   :  { %v69_v8 = vmul.f32 %v56_v6, %v56_v6  ;;  %p195_p13 = por %p194_p12, %p193_p11 }
  0x3c   :  { %v59_v9 = vsel %vm58_vm0, %v57_v7, 0.0 }
  0x3d   :  { %60 = vadd.xlane.f32.xlu0 %v59_v9  ;;  %v70_v10 = vsel %vm58_vm0, %v69_v8, 0.0  ;;  %p196_p0 = pnand %p195_p13, %p189_p10 }
  0x41   :  { %71 = vadd.xlane.f32.xlu0 %v70_v10 }
  0xca   :  { %v61_v11 = vpop.xlane.xlu0 %60 }
  0xcb   :  { %118 = vrsqrt.f32 %v61_v11  ;;  %vm64_vm1 = vcmp.eq.f32.partialorder %v61_v11, inf  ;;  %v67_v18 = vand.u32 2147483648, %v61_v11  ;;  %vm66_vm3 = vcmp.eq.f32.partialorder %v61_v11, 0.0 }
  0xce   :  { %v72_v12 = vpop.xlane.xlu0 %71 }
  0xcf   :  { %120 = vrsqrt.f32 %v72_v12  ;;  %vm75_vm2 = vcmp.eq.f32.partialorder %v72_v12, inf  ;;  %v78_v19 = vand.u32 2147483648, %v72_v12  ;;  %vm77_vm4 = vcmp.eq.f32.partialorder %v72_v12, 0.0 }
  0xd5   :  { %v119_v13 = vpop.eup %118 }
  0xd6   :  { %v63_v14 = vmul.f32 %v119_v13, %v61_v11 }
  0xd8   :  { %v65_v17 = vsel %vm64_vm1, %v61_v11, %v63_v14 }
  0xd9   :  { %v121_v15 = vpop.eup %120  ;;  %v68_v21 = vsel %vm66_vm3, %v67_v18, %v65_v17 }
  0xda   :  { %v74_v16 = vmul.f32 %v121_v15, %v72_v12 }
  0xdc   :  { %v76_v20 = vsel %vm75_vm2, %v72_v12, %v74_v16 }
  0xdd   :  { %v79_v22 = vsel %vm77_vm4, %v78_v19, %v76_v20 }
  0xde   :  { %v80_v23 = vsub.f32 %v68_v21, %v79_v22 }
  0xe0   :  { %v81_v24 = vadd.f32 1.0, %v80_v23 }
  0xe2   :  { %v82_v25 = vmax.f32 %v81_v24, 0.0 }
  0xe4   :  { %v84_v26 = vsel %vm83_vm5, %v82_v25, 0.0 }
  0xe5   :  { %85 = vadd.xlane.f32.xlu1 %v84_v26 }
 0x172   :  { %v86_v27 = vpop.xlane.xlu1 %85 }
 0x173   :  { %v87_v28 = vrot.slane %v86_v27, 4 }
 0x175   :  { %v88_v29 = vadd.f32 %v87_v28, %v86_v27 }
 0x177   :  { %v89_v30 = vrot.slane %v88_v29, 2 }
 0x179   :  { %v90_v31 = vadd.f32 %v89_v30, %v88_v29 }
 0x17b   :  { %v91_v32 = vrot.slane %v90_v31, 1 }
 0x17d   :  { %v92_v33 = vadd.f32 %v91_v32, %v90_v31 }
 0x17f   :  { %112 = vpush %v92_v33 }
 0x1b0   :  { %s113_s20 = spop %112 }
 0x1b1   :  { %v94_v34 = vstv %s113_s20 }
 0x1b2   :  { %95 = vst [vmem:[#allocation8] sm:$0xff] %v94_v34 }
 0x1b3   :  { %199 = shalt.err (!%p196_p0)
}
 0x1b4   :  { %s200_s24 = scalar_lea.hbm %s291_s3, 128 }
 0x1b5   :  { %p201_p1 = scmp.ne.s32.totalorder %s291_s3, %s200_s24  ;;  %p204_p2 = scmp.lt.u32.totalorder %s200_s24, %s291_s3 }
 0x1b7   :  { %p206_p3 = pnand %p204_p2, %p201_p1 }
 0x1b9   :  { %209 = shalt.err (!%p206_p3)
}
 0x1ba   :  { %105 = dma.vmem_to_hbm [thread:$0]  %s103_s19, 128, %s291_s3, [#allocation4]  }
 0x1bb   :  { %214 = dma.done.wait [#allocation4], 128  }
 0x1bc   :  { %215 = vsyncadd [#allocation4], 4294967168 }
 0x1bd   :  { %109 = vsyncpa [#allocation3], 1 }
 0x1be   :  { %110 = vsyncpa [#allocation6], 1 }
 0x1bf   :  { %111 = vsyncpa [#allocation4], 1 }

</bundles_post_ra>
